<compile_context>
chip_gen: v5e
topology: v5e:2x2
jax: 0.10.0
libtpu: 0.0.40
codegen_flags: <defaults>
</compile_context>

<pallas_src>
import math
import jax
import jax.numpy as jnp
from jax import lax
from jax.experimental import pallas as pl
from jax.experimental.pallas import tpu as pltpu


def _round_up(x, m):
    return ((x + m - 1) // m) * m


# ----------------------------------------------------------------------------
# Pallas kernel: (im2col conv matmul) + (bf16 multi-hot temporal lookup matmul) + pe add
# ----------------------------------------------------------------------------
def data_embedding_kernel(x_ref, idx_ref, pe_ref, w_ref, tab_ref, o_ref):
    # x_ref:   (1, TL, 3*c_in) f32   im2col'd circular-conv inputs for this (batch, seq-block)
    # idx_ref: (1, TL, 4)      i32   offset-adjusted indices into the padded temporal table
    # pe_ref:  (TL, d)         f32   positional-embedding rows for this seq-block
    # w_ref:   (3*c_in, d)     f32   stacked conv taps (tap-major, channel-minor), grid-invariant
    # tab_ref: (K128, d)       bf16  concat(month|day|weekday|hour) zero-padded to 128 rows
    # o_ref:   (1, TL, d)
    tl = pe_ref.shape[0]
    k128 = tab_ref.shape[0]
    n_feat = idx_ref.shape[-1]

    # TokenEmbedding: circular conv1d(k=3, bias=False) collapsed into one K=3*c_in matmul.
    # Kept f32: K is tiny so the f32 MXU cost is noise, and the value path keeps full fidelity.
    y = jnp.dot(x_ref[0], w_ref[...], preferred_element_type=jnp.float32)       # (TL, d)

    # TemporalEmbedding (fixed): 4 exact lookups fused as one multi-hot @ table matmul on the
    # native bf16 MXU path.  The 4 features occupy disjoint row ranges of the table, so the
    # multi-hot is an OR of the compares (== their sum), cast once to bf16 (0/1 is exact).
    idx = idx_ref[0]                                                   # (TL, 4) i32
    col = lax.broadcasted_iota(jnp.int32, (tl, k128), 1)               # (TL, K128)
    hit = col == idx[:, 0:1]
    for j in range(1, n_feat):
        hit = jnp.logical_or(hit, col == idx[:, j:j + 1])
    mh = hit.astype(jnp.bfloat16)                                      # (TL, K128) 0/1
    y = y + jnp.dot(mh, tab_ref[...], preferred_element_type=jnp.float32)

    # PositionalEmbedding: streamed per seq-block via its own BlockSpec; just add.
    o_ref[0] = (y + pe_ref[...]).astype(o_ref.dtype)


def _data_embedding_pallas(x_stack, idx, pe, w_conv, table, tl, out_dtype):
    B, L_pad, ki = x_stack.shape
    d_model = pe.shape[1]
    n_feat = idx.shape[-1]
    return pl.pallas_call(
        data_embedding_kernel,
        out_shape=jax.ShapeDtypeStruct((B, L_pad, d_model), out_dtype),
        grid_spec=pltpu.PrefetchScalarGridSpec(
            num_scalar_prefetch=0,
            grid=(B, L_pad // tl),
            in_specs=[
                pl.BlockSpec((1, tl, ki), lambda b, j: (b, j, 0)),
                pl.BlockSpec((1, tl, n_feat), lambda b, j: (b, j, 0)),
                pl.BlockSpec((tl, d_model), lambda b, j: (j, 0)),       # pe: rectangular DMA
                # Grid-invariant constants: single-buffered, resident in VMEM.
                pl.BlockSpec(w_conv.shape, lambda b, j: (0, 0),
                             pipeline_mode=pl.Buffered(1)),
                pl.BlockSpec(table.shape, lambda b, j: (0, 0),
                             pipeline_mode=pl.Buffered(1)),
            ],
            out_specs=pl.BlockSpec((1, tl, d_model), lambda b, j: (b, j, 0)),
        ),
        compiler_params=pltpu.CompilerParams(
            dimension_semantics=("parallel", "parallel"),
            vmem_limit_bytes=32 * 1024 * 1024,
        ),
    )(x_stack, idx, pe, w_conv, table)


# ----------------------------------------------------------------------------
# Parameter / table construction (glue, plain JAX)
# ----------------------------------------------------------------------------
def sinusoid_table(n_pos, d_model):
    """Matches PositionalEmbedding / FixedEmbedding table construction."""
    position = jnp.arange(n_pos, dtype=jnp.float32)[:, None]
    div_term = jnp.exp(jnp.arange(0, d_model, 2, dtype=jnp.float32)
                       * (-(math.log(10000.0) / d_model)))
    tab = jnp.zeros((n_pos, d_model), dtype=jnp.float32)
    tab = tab.at[:, 0::2].set(jnp.sin(position * div_term))
    tab = tab.at[:, 1::2].set(jnp.cos(position * div_term))
    return tab


def make_conv_weight(key, c_in, d_model, kernel_size=3):
    """kaiming_normal_(mode='fan_in', nonlinearity='leaky_relu') for torch Conv1d weight
    (d_model, c_in, k); returned rearranged to (k, c_in, d_model)."""
    gain = math.sqrt(2.0 / (1.0 + 0.01 ** 2))
    fan_in = c_in * kernel_size
    std = gain / math.sqrt(fan_in)
    w = std * jax.random.normal(key, (d_model, c_in, kernel_size), dtype=jnp.float32)
    return jnp.transpose(w, (2, 1, 0))  # (d, c, k) -> (k, c, d)


# ----------------------------------------------------------------------------
# Forward (embed_type='fixed', freq='h'); dropout is eval-mode identity.
# ----------------------------------------------------------------------------
def data_embedding_forward(x, x_mark, params, out_dtype=jnp.float32):
    B, L, c_in = x.shape
    d_model = params["w_taps"].shape[-1]
    ki = 3 * c_in

    # TokenEmbedding im2col: row l holds [x[l-1], x[l], x[l+1]] (circular, matches
    # Conv1d(padding=1, padding_mode='circular')).
    x_prev = jnp.roll(x, 1, axis=1)
    x_next = jnp.roll(x, -1, axis=1)
    x_stack = jnp.concatenate([x_prev, x, x_next], axis=-1)            # (B, L, 3*c_in) f32
    w_conv = params["w_taps"].reshape(ki, d_model)                     # (3*c_in, d) f32

    # TemporalEmbedding: one small resident table (76 rows -> zero-padded to 128), bf16.
    tabs = (params["month_tab"], params["day_tab"], params["weekday_tab"], params["hour_tab"])
    n_rows = sum(t.shape[0] for t in tabs)                             # 13+32+7+24 = 76
    k128 = _round_up(n_rows, 128)
    table = jnp.concatenate(tabs, axis=0)
    table = jnp.pad(table, ((0, k128 - n_rows), (0, 0))).astype(jnp.bfloat16)
    pad_row = k128 - 1                                                 # an all-zero row

    if x_mark is not None:
        xm = x_mark.astype(jnp.int32)
        # x_mark column order (freq='h'): 0=month, 1=day, 2=weekday, 3=hour
        cols, off = [], 0
        for feat_col, t in enumerate(tabs):
            cols.append(xm[:, :, feat_col] + off)
            off += t.shape[0]
        idx = jnp.stack(cols, axis=-1)                                 # (B, L, 4) i32
        # NOTE: out-of-range marks select a zero row (contribute 0); torch nn.Embedding raises.
    else:
        # No temporal marks: every lookup points at a zero pad row -> temporal term == 0.
        idx = jnp.full((B, L, 4), pad_row, dtype=jnp.int32)

    # PositionalEmbedding rows for this sequence length.
    pe = params["pe"][:L]                                              # (L, d_model) f32

    # Tiling: 2-D grid (batch, seq-block); lane-dense (TL, d_model) output slabs.
    # TL up to 1024 rows, clamped so double-buffered pe/out blocks stay inside ~24 MiB
    # (well under the 32 MiB scoped-VMEM limit even on v7x).
    tl = _round_up(L, 8) if L <= 1024 else 1024
    budget_rows = max(8, ((6 << 20) // (4 * d_model)) // 8 * 8)        # ~6 MiB per (TL, d) f32 buf
    tl = min(tl, budget_rows)
    L_pad = _round_up(L, tl)
    if L_pad != L:
        x_stack = jnp.pad(x_stack, ((0, 0), (0, L_pad - L), (0, 0)))
        idx = jnp.pad(idx, ((0, 0), (0, L_pad - L), (0, 0)), constant_values=pad_row)
        pe = jnp.pad(pe, ((0, L_pad - L), (0, 0)))

    out = _data_embedding_pallas(x_stack, idx, pe, w_conv, table, tl, out_dtype)
    # TODO(synk): nn.Dropout(p=0.1) is stochastic in train mode; eval-mode identity used here.
    return out[:, :L, :]


# ----------------------------------------------------------------------------
# Pure-JAX reference (fp32) for a correctness check
# ----------------------------------------------------------------------------
def data_embedding_ref(x, x_mark, params):
    # TODO(synk): validate once against the actual PyTorch module (tap ordering / circular pad).
    B, L, _ = x.shape
    w = params["w_taps"]  # (3, c_in, d)
    x_prev = jnp.roll(x, 1, axis=1)
    x_next = jnp.roll(x, -1, axis=1)
    y = (jnp.einsum("blc,cd->bld", x_prev, w[0])
         + jnp.einsum("blc,cd->bld", x, w[1])
         + jnp.einsum("blc,cd->bld", x_next, w[2]))
    xm = x_mark.astype(jnp.int32)
    temporal = (params["month_tab"][xm[:, :, 0]] + params["day_tab"][xm[:, :, 1]]
                + params["weekday_tab"][xm[:, :, 2]] + params["hour_tab"][xm[:, :, 3]])
    return y + temporal + params["pe"][:L][None, :, :]


if __name__ == "__main__":
    # d_model=128 exercises the lane-dense output path (d_model < 128 would hit masked stores).
    B, L, c_in, d_model = 2, 16, 4, 128
    key = jax.random.PRNGKey(0)
    k_w, k_x, k_m = jax.random.split(key, 3)

    params = {
        "w_taps": make_conv_weight(k_w, c_in, d_model),
        "pe": sinusoid_table(5000, d_model),
        "hour_tab": sinusoid_table(24, d_model),
        "weekday_tab": sinusoid_table(7, d_model),
        "day_tab": sinusoid_table(32, d_model),
        "month_tab": sinusoid_table(13, d_model),
    }

    x = jax.random.normal(k_x, (B, L, c_in), dtype=jnp.float32)
    # time marks: [month(0..12), day(0..31), weekday(0..6), hour(0..23)]
    x_mark = jnp.stack([
        jax.random.randint(jax.random.fold_in(k_m, 0), (B, L), 0, 13),
        jax.random.randint(jax.random.fold_in(k_m, 1), (B, L), 0, 32),
        jax.random.randint(jax.random.fold_in(k_m, 2), (B, L), 0, 7),
        jax.random.randint(jax.random.fold_in(k_m, 3), (B, L), 0, 24),
    ], axis=-1)

    out = data_embedding_forward(x, x_mark, params)
    jax.block_until_ready(out)
    assert out.shape == (B, L, d_model)

    ref = data_embedding_ref(x, x_mark, params)
    err = float(jnp.max(jnp.abs(out - ref)))
    # Conv and positional paths are full f32; only the 4 temporal table values are bf16
    # (~4e-3 abs each), so the tolerance can be tight.
    assert err < 0.05, f"max abs err vs fp32 reference: {err}"
    print("KERNEL_OK")
</pallas_src>

<mosaic_0001>
module attributes {stable_mosaic.version = 11 : i64} {
  func.func @data_embedding_kernel(%arg0: i32, %arg1: i32, %arg2: memref<1x16x12xf32, #tpu.memory_space<vmem>>, %arg3: memref<1x16x4xi32, #tpu.memory_space<vmem>>, %arg4: memref<16x128xf32, #tpu.memory_space<vmem>>, %arg5: memref<12x128xf32, #tpu.memory_space<vmem>>, %arg6: memref<128x128xbf16, #tpu.memory_space<vmem>>, %arg7: memref<1x16x128xf32, #tpu.memory_space<vmem>>) attributes {dimension_semantics = [#tpu.dimension_semantics<parallel>, #tpu.dimension_semantics<parallel>], iteration_bounds = array<i64: 2, 1>, scalar_prefetch = 0 : i64, scratch_operands = 0 : i64, tpu.core_type = #tpu.core_type<tc>, window_params = [{transform_indices = @transform_0, window_bounds = array<i64: 1, 16, 12>}, {transform_indices = @transform_1, window_bounds = array<i64: 1, 16, 4>}, {transform_indices = @transform_2, window_bounds = array<i64: 16, 128>}, {pipeline_mode = #tpu.pipeline_mode<synchronous>, transform_indices = @transform_3, window_bounds = array<i64: 12, 128>}, {pipeline_mode = #tpu.pipeline_mode<synchronous>, transform_indices = @transform_4, window_bounds = array<i64: 128, 128>}, {transform_indices = @transform_5, window_bounds = array<i64: 1, 16, 128>}]} {
    %c0 = arith.constant 0 : index
    %c0_0 = arith.constant 0 : index
    %c0_1 = arith.constant 0 : index
    %0 = vector.load %arg2[%c0, %c0_0, %c0_1] : memref<1x16x12xf32, #tpu.memory_space<vmem>>, vector<1x16x12xf32>
    %1 = vector.shape_cast %0 : vector<1x16x12xf32> to vector<16x12xf32>
    %c0_2 = arith.constant 0 : index
    %c0_3 = arith.constant 0 : index
    %2 = vector.load %arg5[%c0_2, %c0_3] : memref<12x128xf32, #tpu.memory_space<vmem>>, vector<12x128xf32>
    %cst = arith.constant dense<0.000000e+00> : vector<16x128xf32>
    %3 = tpu.matmul %1, %2, %cst {dimension_numbers = #tpu.dot_dimension_numbers<[1], [0], [0], [1], [0, 0, 1, 1], [], []>} : vector<16x12xf32>, vector<12x128xf32>, vector<16x128xf32> -> vector<16x128xf32>
    %c0_4 = arith.constant 0 : index
    %c0_5 = arith.constant 0 : index
    %c0_6 = arith.constant 0 : index
    %4 = vector.load %arg3[%c0_4, %c0_5, %c0_6] : memref<1x16x4xi32, #tpu.memory_space<vmem>>, vector<1x16x4xi32>
    %5 = vector.shape_cast %4 : vector<1x16x4xi32> to vector<16x4xi32>
    %6 = tpu.iota {dimensions = array<i32: 1>} : vector<16x128xi32>
    %7 = vector.extract_strided_slice %5 {offsets = [0, 0], sizes = [16, 1], strides = [1, 1]} : vector<16x4xi32> to vector<16x1xi32>
    %8 = vector.broadcast %7 : vector<16x1xi32> to vector<16x128xi32>
    %9 = arith.cmpi eq, %6, %8 : vector<16x128xi32>
    %10 = vector.extract_strided_slice %5 {offsets = [0, 1], sizes = [16, 1], strides = [1, 1]} : vector<16x4xi32> to vector<16x1xi32>
    %11 = vector.broadcast %10 : vector<16x1xi32> to vector<16x128xi32>
    %12 = arith.cmpi eq, %6, %11 : vector<16x128xi32>
    %13 = arith.ori %9, %12 : vector<16x128xi1>
    %14 = vector.extract_strided_slice %5 {offsets = [0, 2], sizes = [16, 1], strides = [1, 1]} : vector<16x4xi32> to vector<16x1xi32>
    %15 = vector.broadcast %14 : vector<16x1xi32> to vector<16x128xi32>
    %16 = arith.cmpi eq, %6, %15 : vector<16x128xi32>
    %17 = arith.ori %13, %16 : vector<16x128xi1>
    %18 = vector.extract_strided_slice %5 {offsets = [0, 3], sizes = [16, 1], strides = [1, 1]} : vector<16x4xi32> to vector<16x1xi32>
    %19 = vector.broadcast %18 : vector<16x1xi32> to vector<16x128xi32>
    %20 = arith.cmpi eq, %6, %19 : vector<16x128xi32>
    %21 = arith.ori %17, %20 : vector<16x128xi1>
    %22 = arith.extui %21 : vector<16x128xi1> to vector<16x128xi32>
    %23 = arith.sitofp %22 : vector<16x128xi32> to vector<16x128xf32>
    %24 = arith.truncf %23 : vector<16x128xf32> to vector<16x128xbf16>
    %c0_7 = arith.constant 0 : index
    %c0_8 = arith.constant 0 : index
    %25 = vector.load %arg6[%c0_7, %c0_8] : memref<128x128xbf16, #tpu.memory_space<vmem>>, vector<128x128xbf16>
    %cst_9 = arith.constant dense<0.000000e+00> : vector<16x128xf32>
    %26 = tpu.matmul %24, %25, %cst_9 {dimension_numbers = #tpu.dot_dimension_numbers<[1], [0], [0], [1], [0, 0, 1, 1], [], []>} : vector<16x128xbf16>, vector<128x128xbf16>, vector<16x128xf32> -> vector<16x128xf32>
    %27 = arith.addf %3, %26 : vector<16x128xf32>
    %c0_10 = arith.constant 0 : index
    %c0_11 = arith.constant 0 : index
    %28 = vector.load %arg4[%c0_10, %c0_11] : memref<16x128xf32, #tpu.memory_space<vmem>>, vector<16x128xf32>
    %29 = arith.addf %27, %28 : vector<16x128xf32>
    %c0_12 = arith.constant 0 : index
    %c0_13 = arith.constant 0 : index
    %c0_14 = arith.constant 0 : index
    %30 = vector.load %arg7[%c0_12, %c0_13, %c0_14] : memref<1x16x128xf32, #tpu.memory_space<vmem>>, vector<1x16x128xf32>
    %31 = vector.shape_cast %30 : vector<1x16x128xf32> to vector<16x128xf32>
    %32 = vector.shape_cast %29 : vector<16x128xf32> to vector<1x16x128xf32>
    tpu.vector_store %arg7[%c0_12, %c0_13, %c0_14], %32 {strides = array<i32>} : memref<1x16x128xf32, #tpu.memory_space<vmem>>, vector<1x16x128xf32>,
    return
  }
  func.func @transform_0(%arg0: i32, %arg1: i32) -> (i32, i32, i32) {
    %c0_i32 = arith.constant 0 : i32
    %c0_i32_0 = arith.constant 0 : i32
    return %arg0, %arg1, %c0_i32 : i32, i32, i32
  }
  func.func @transform_1(%arg0: i32, %arg1: i32) -> (i32, i32, i32) {
    %c0_i32 = arith.constant 0 : i32
    %c0_i32_0 = arith.constant 0 : i32
    return %arg0, %arg1, %c0_i32 : i32, i32, i32
  }
  func.func @transform_2(%arg0: i32, %arg1: i32) -> (i32, i32) {
    %c0_i32 = arith.constant 0 : i32
    %c0_i32_0 = arith.constant 0 : i32
    return %arg1, %c0_i32 : i32, i32
  }
  func.func @transform_3(%arg0: i32, %arg1: i32) -> (i32, i32) {
    %c0_i32 = arith.constant 0 : i32
    %c0_i32_0 = arith.constant 0 : i32
    %c0_i32_1 = arith.constant 0 : i32
    return %c0_i32, %c0_i32_0 : i32, i32
  }
  func.func @transform_4(%arg0: i32, %arg1: i32) -> (i32, i32) {
    %c0_i32 = arith.constant 0 : i32
    %c0_i32_0 = arith.constant 0 : i32
    %c0_i32_1 = arith.constant 0 : i32
    return %c0_i32, %c0_i32_0 : i32, i32
  }
  func.func @transform_5(%arg0: i32, %arg1: i32) -> (i32, i32, i32) {
    %c0_i32 = arith.constant 0 : i32
    %c0_i32_0 = arith.constant 0 : i32
    return %arg0, %arg1, %c0_i32 : i32, i32, i32
  }
}

</mosaic_0001>

<bundles_post_ra>
// kernel: tpu_custom_call.1
= control target key start
LH: loop header
LB: loop body
LE: loop exit
PB: predicated region body
PF: predicated region fallthrough
CT: control target
= control target key end

     0   :  { %10 = vsyncpa [#allocation3], 0  ;;  %s1082_s0 = inlined_call_operand.vmem [shape: f32[2,16,12], index: 0, kind: input, shape index: {}]   ;;  %s1083_s1 = inlined_call_operand.vmem [shape: s32[2,16,4], index: 1, kind: input, shape index: {}]   ;;  %s1084_s2 = inlined_call_operand.vmem [shape: f32[16,128], index: 2, kind: input, shape index: {}]   ;;  %s1085_s3 = inlined_call_operand.hbm [shape: f32[12,128], index: 3, kind: input, shape index: {}]   ;;  %s1086_s4 = inlined_call_operand.vmem [shape: bf16[128,128], index: 4, kind: input, shape index: {}]   ;;  %s1087_s5 = inlined_call_operand.hbm [shape: f32[2,16,128], index: 5, kind: output, shape index: {}]  }
   0x1   :  { %11 = vsyncpa [#allocation4], 0 }
   0x2   :  { %13 = vsyncpa [#allocation4 + $0x1], 0  ;;  %s942_s18 = smov 0   ;;  %s944_s19 = smov 0  }
   0x3   :  { %s946_s20 = smov 0   ;;  %s948_s21 = smov 0  }
   0x4   :  { %s950_s22 = smov 0   ;;  %s952_s23 = smov 0  }
   0x5 LB: > { %s640_s24 = sadd.s32 4294967295, %s900_s23   ;;  %s641_s25 = sadd.s32 4294967294, %s900_s23   ;;  %s900_s23 = sphi %s952_s23, %s19_s23   ;;  %s896_s22 = sphi %s950_s22, %s1094_s22   ;;  %s892_s21 = sphi %s948_s21, %s1093_s21   ;;  %s888_s20 = sphi %s946_s20, %s1092_s20   ;;  %s884_s19 = sphi %s944_s19, %s1091_s19   ;;  %s880_s18 = sphi %s942_s18, %s1090_s18  }
   0x6   : > { %s31_s26 = sadd.s32 1, %s896_s22  ;;  %s164_s27 = sadd.s32 1, %s888_s20 }
   0x7   : > { %p33_p0 = scmp.ge.s32.totalorder %s31_s26, 2  ;;  %p174_p1 = scmp.ne.s32.totalorder %s888_s20, %s884_s19 }
   0x8   : > { %p175_p2 = scmp.eq.s32.totalorder %s640_s24, 1  ;;  %p180_p3 = scmp.ne.s32.totalorder %s884_s19, %s880_s18 }
   0x9   : > { %s1096_s26 = smov (%p33_p0, %s31_s26), 0  ;;  %p181_p5 = scmp.eq.s32.totalorder %s641_s25, 1 }
   0xa   : > { %p982_p4 = por %p175_p2, %p174_p1  ;;  %s159_s29 = ssub.s32 %s896_s22, %s1096_s26 }
   0xb   : > { %p642_p6 = scmp.ge.s32.totalorder %s900_s23, 1  ;;  %p162_p7 = scmp.eq.s32.totalorder %s159_s29, 0 }
   0xc   : > { %p989_p8 = por %p181_p5, %p180_p3  ;;  %p188_p9 = scmp.lt.s32.totalorder %s900_s23, 3 }
   0xd   : > { %s995_s6 = scalar_select %p162_p7, %s888_s20, %s164_s27  }
   0xe   : > { %p189_p10 = pnand %p642_p6, %p188_p9  ;;  %p722_p11 = scmp.eq.s32.totalorder %s640_s24, 0 }
   0xf   : > { %s208_s9 = sshll.u32 %s1085_s3, 4  ;;  %s902_s10 = smov [#allocation2]   ;;  %s209_s9 = int_to_ptr.hbm [resolvable:$true] %s208_s9 }
  0x10   : > { %p714_p12 = pneg %p189_p10  ;;  %s210_s11 = sshll.u32 %s902_s10, 4  ;;  %s211_s11 = int_to_ptr.vmem [resolvable:$true] %s210_s11 }
  0x11   : > { %s903_s12 = smov 128   ;;  %s904_s13 = smov 8  }
  0x12   : > { %p715_p13 = pnand %p722_p11, %p714_p12  ;;  %255 = sbr.rel (%p189_p10) target bundleno = 309 (0x135), region = 40 }
  0x14   : > { %717 = dma.hbm_to_vmem [thread:$0]  (!%p715_p13), %s209_s9, 256, %s211_s11, [#allocation3], %s903_s12, %s903_s12, %s904_s13  }
  0x17   : > { %871 = dma.done.wait (%p722_p11), [#allocation3], 256  }
  0x18   : > { %873 = vsyncadd (%p722_p11), [#allocation3], 4294967040  ;;  %p303_p0 = scmp.lt.s32.totalorder %s892_s21, 1  ;;  %v905_v0 = vmov 1   ;;  %v906_v1 = vmov 0   ;;  %v907_v2 = vmov 2   ;;  %v335_v21 = vlaneseq }
  0x19   : > { %784 = vset.pattern.permute.xlu1 %v905_v0  ;;  %783 = vset.pattern.permute.xlu0 %v906_v1  ;;  %v706_v4 = vld [vmem:[%s1086_s4 + $0x38] sm:$0xff]  ;;  %v705_v5 = vld [vmem:[%s1086_s4 + $0x30] sm:$0xff]  ;;  %v704_v7 = vld [vmem:[%s1086_s4 + $0x28] sm:$0xff]  ;;  %v908_v8 = vmov 3   ;;  %vm465_vm0 = vcmask 1043456   ;;  %vm458_vm1 = vcmask 97280  }
  0x1a   : > { %s1002_s14 = scalar_select %p303_p0, %s892_s21, 1  ;;  %785 = vset.pattern.permute.xlu2 %v907_v2  ;;  %444 = vmatpush.bf16.msra.mxu0 %v706_v4  ;;  %v703_v9 = vld [vmem:[%s1086_s4 + $0x20] sm:$0xff]  ;;  %v702_v10 = vld [vmem:[%s1086_s4 + $0x18] sm:$0xff]  ;;  %v701_v11 = vld [vmem:[%s1086_s4 + $0x10] sm:$0xff]  ;;  %v336_v22 = vand.u32 127, %v335_v21 }
  0x1b   : > { %v700_v12 = vld [vmem:[%s1086_s4 + $0x8] sm:$0xff]  ;;  %v699_v13 = vld [vmem:[%s1086_s4] sm:$0xff]  ;;  %v909_v28 = vmov 1.0|1.0   ;;  %s707_s12 = sshll.u32 %s892_s21, 4  ;;  %s838_s11 = scalar_lea.hbm %s1087_s5, 32 }
  0x1c   : > { %s697_s15 = sshll.u32 %s1002_s14, 4  ;;  %v332_v14 = vld [vmem:[#allocation2 + $0x8] sm:$0xf]  ;;  %v331_v15 = vld [vmem:[#allocation2] sm:$0xff]  ;;  %s299_s14 = sand.u32 1, %s884_s19  }
  0x1d   : > { %s320_s24 = scalar_lea.vmem %s1083_s1, %s697_s15  ;;  %s310_s9 = scalar_lea.vmem %s1082_s0, %s697_s15  ;;  %689 = vmatpush.msk.msra.mxu1 %vm465_vm0, %v332_v14  ;;  %v492_v31 = vld [vmem:[%s1084_s2] sm:$0xff]  ;;  %v493_v36 = vld [vmem:[%s1084_s2 + $0x8] sm:$0xff] }
  0x1e   : > { %v333_v3 = vld [vmem:[%s320_s24] sm:$0xff]  ;;  %v334_v6 = vld [vmem:[%s320_s24 + $0x8] sm:$0xff]  ;;  %445 = vmatpush.bf16.msra.mxu0 %v705_v5  ;;  %s648_s15 = sshll.u32 %s299_s14, 4  ;;  %s512_s17 = scalar_lea.hbm %s1087_s5, %s707_s12 }
  0x1f   : > { %346 = vperm.xlu1 %784, %v333_v3   ;;  %338 = vperm.xlu0 %783, %v333_v3   ;;  %v329_v16 = vld [vmem:[%s310_s9] sm:$0xff]  ;;  %v330_v17 = vld [vmem:[%s310_s9 + $0x8] sm:$0xff]  ;;  %s301_s24 = scalar_lea.vmem [#allocation5], %s648_s15  ;;  %s515_s27 = sshll.u32 %s512_s17, 4  ;;  %s516_s27 = int_to_ptr.hbm [resolvable:$true] %s515_s27 }
  0x20   : > { %356 = vperm.xlu2 %785, %v333_v3   ;;  %484 = vmatpush.msra.mxu1 %v331_v15  ;;  %s513_s25 = sshll.u32 %s301_s24, 4  ;;  %s499_s21 = scalar_lea.sflag [#allocation4], %s299_s14  ;;  %s514_s25 = int_to_ptr.vmem [resolvable:$true] %s513_s25 }
  0x21   : > { %690 = vmatmul.msk.f32.vlgmr.msra.gmra.mxu1 %vm458_vm1, %v329_v16  ;;  %s832_s8 = sshra.s32 %s516_s27, 4  ;;  %s833_s8 = int_to_ptr.hbm [resolvable:$true] %s832_s8 }
  0x22   : > { %446 = vmatpush.bf16.msra.mxu0 %v704_v7  ;;  %s834_s9 = scalar_lea.hbm %s833_s8, 16  ;;  %p839_p5 = scmp.lt.s32.totalorder %s833_s8, %s1087_s5 }
  0x23   : > { %p835_p1 = scmp.ne.s32.totalorder %s833_s8, %s834_s9  ;;  %p840_p6 = scmp.lt.s32.totalorder %s838_s11, %s834_s9 }
  0x25   : > { %p836_p2 = pnand %p835_p1, %p982_p4  ;;  %p841_p7 = por %p840_p6, %p839_p5 }
  0x26   : > { %447 = vmatpush.bf16.msra.mxu0 %v703_v9 }
  0x27   : > { %349 = vperm.xlu1 %784, %v334_v6   ;;  %341 = vperm.xlu0 %783, %v334_v6   ;;  %p837_p3 = pneg %p836_p2 }
  0x28   : > { %359 = vperm.xlu2 %785, %v334_v6  }
  0x29   : > { %691 = vmatmul.msk.f32.gmra.mxu1 %vm458_vm1, %v330_v17  ;;  %p842_p9 = pnand %p841_p7, %p837_p3 }
  0x2a   : > { %448 = vmatpush.bf16.msra.mxu0 %v702_v10 }
  0x2e   : > { %449 = vmatpush.bf16.msra.mxu0 %v701_v11 }
  0x2f   : > { %787 = vset.pattern.permute.xlu1 %v908_v8  ;;  %786 = vset.pattern.permute.xlu0 %v908_v8 }
  0x30   : > { %369 = vperm.xlu1 %787, %v334_v6   ;;  %366 = vperm.xlu0 %786, %v333_v3  }
  0x32   : > { %450 = vmatpush.bf16.msra.mxu0 %v700_v12 }
  0x36   : > { %451 = vmatpush.bf16.msra.mxu0 %v699_v13 }
  0x7a   : > { %v357_v20 = vpop.permute.xlu2 %356 }
  0x7b   : > { %vm361_vm6 = vcmp.eq.s32.totalorder %v336_v22, %v357_v20 }
  0x82   : > { %v360_v25 = vpop.permute.xlu2 %359 }
  0x83   : > { %vm362_vm8 = vcmp.eq.s32.totalorder %v336_v22, %v360_v25 }
  0x91   : > { %v347_v18 = vpop.permute.xlu1 %346  ;;  %v339_v19 = vpop.permute.xlu0 %338 }
  0x92   : > { %vm351_vm2 = vcmp.eq.s32.totalorder %v336_v22, %v347_v18  ;;  %vm343_vm3 = vcmp.eq.s32.totalorder %v336_v22, %v339_v19 }
  0x93   : > { %vm353_vm7 = vmor %vm343_vm3, %vm351_vm2 }
  0x94   : > { %vm363_vm10 = vmor %vm353_vm7, %vm361_vm6 }
  0x99   : > { %v350_v23 = vpop.permute.xlu1 %349  ;;  %v342_v24 = vpop.permute.xlu0 %341 }
  0x9a   : > { %vm352_vm4 = vcmp.eq.s32.totalorder %v336_v22, %v350_v23  ;;  %vm344_vm5 = vcmp.eq.s32.totalorder %v336_v22, %v342_v24 }
  0x9b   : > { %vm354_vm9 = vmor %vm344_vm5, %vm352_vm4 }
  0x9c   : > { %vm364_vm11 = vmor %vm354_vm9, %vm362_vm8 }
  0x9e   : > { %v486_v29 = vpop.f32.mrf.mxu1 }
  0xa2   : > { %v370_v26 = vpop.permute.xlu1 %369  ;;  %v367_v27 = vpop.permute.xlu0 %366 }
  0xa3   : > { %vm372_vm12 = vcmp.eq.s32.totalorder %v336_v22, %v370_v26  ;;  %vm371_vm13 = vcmp.eq.s32.totalorder %v336_v22, %v367_v27 }
  0xa4   : > { %vm374_vm14 = vmor %vm364_vm11, %vm372_vm12 }
  0xa5   : > { %vm373_vm15 = vmor %vm363_vm10, %vm371_vm13 }
  0xa6   : > { %vm687_vm0 = vmpackc.low %vm374_vm14, %vm373_vm15  ;;  %v489_v34 = vpop.f32.mrf.mxu1 }
  0xa7   : > { %688 = vmatmul.msk.bf16.vlgmr.msra.gmra.mxu0 %vm687_vm0, %v909_v28 }
 0x124   : > { %v453_v30 = vpop.f32.mrf.mxu0 }
 0x125   : > { %v487_v32 = vadd.f32 %v486_v29, %v453_v30 }
 0x127   : > { %v494_v33 = vadd.f32 %v492_v31, %v487_v32 }
 0x129   : > { %496 = vst [vmem:[%s301_s24] sm:$0xff] %v494_v33 }
 0x12c   : > { %v455_v35 = vpop.f32.mrf.mxu0 }
 0x12d   : > { %v490_v37 = vadd.f32 %v489_v34, %v455_v35 }
 0x12f   : > { %v495_v38 = vadd.f32 %v493_v36, %v490_v37 }
 0x131   : > { %497 = vst [vmem:[%s301_s24 + $0x8] sm:$0xff] %v495_v38 }
 0x132   : > { %845 = shalt.err (!%p842_p9)
}
 0x133   : > { %s910_s14 = smov 128   ;;  %s911_s16 = smov 8  }
 0x134   : > { %712 = dma.vmem_to_hbm [thread:$0]  (%p982_p4), %s514_s25, 256, %s516_s27, %s499_s21, %s910_s14, %s910_s14, %s911_s16  }
 0x135 PF: > { %p724_p10 = scmp.ge.s32.totalorder %s900_s23, 2  ;;  %s530_s17 = sand.u32 1, %s880_s18  }
 0x136   : > { %s531_s24 = scalar_lea.sflag [#allocation4], %s530_s17 }
 0x137   : > { %p719_p11 = pnand %p724_p10, %p989_p8 }
 0x139   : > { %p720_p12 = pneg %p719_p11 }
 0x13b   : > { %875 = dma.done.wait (%p720_p12), %s531_s24, 256  }
 0x13c   : > { %877 = vsyncadd (%p720_p12), %s531_s24, 4294967040  ;;  %s19_s23 = sadd.s32 1, %s900_s23   ;;  %s1090_s18 = smov %s884_s19 }
 0x13d   : > { %p16_p13 = scmp.ge.s32.totalorder %s19_s23, 4   ;;  %s1091_s19 = smov %s888_s20 }
 0x13e   : > { %s1092_s20 = smov %s995_s6  ;;  %s1093_s21 = smov %s896_s22 }
 0x13f   : > { %s1094_s22 = smov %s1096_s26  ;;  %18 = sbr.rel (!%p16_p13) target bundleno = 5 (0x5), region = 86 }
 0x144   :  { %537 = vsyncpa [#allocation3], 1 }
 0x145   :  { %539 = vsyncpa [#allocation3 + $0x1], 1 }
 0x146   :  { %540 = vsyncpa [#allocation4], 1 }
 0x147   :  { %542 = vsyncpa [#allocation4 + $0x1], 1 }

</bundles_post_ra>
